<compile_context>
chip_gen: v7x
topology: tpu7x:2x2x1
jax: 0.10.0
libtpu: 0.0.40
codegen_flags: <defaults>
</compile_context>

<pallas_src>
import jax
import jax.numpy as jnp
from jax.experimental import pallas as pl
from jax.experimental.pallas import tpu as pltpu


# ----------------------------------------------------------------------------
# Kernel 1: module-faithful forward() — identity over the implicit parameter.
# ----------------------------------------------------------------------------
def _implicit_a_kernel(imp_ref, out_ref):
    # forward() is the identity on the implicit parameter.
    out_ref[...] = imp_ref[...]


@jax.jit
def implicit_a_forward(implicit):
    """implicit: (1, C, 1, 1) -> (1, C, 1, 1), identical values (identity forward).

    NOTE: the truly optimal implementation is `return implicit` with no kernel at
    all — a 16-byte identity is 100% launch/DMA overhead. The pallas_call is kept
    only to satisfy the "must use Pallas" constraint, in its cheapest legal form.
    """
    n, c, h, w = implicit.shape
    assert (n, h, w) == (1, 1, 1)

    # Lane-major presentation: C sits on the 128-wide lane axis.
    imp2d = implicit.reshape(1, c)

    out2d = pl.pallas_call(
        _implicit_a_kernel,
        out_shape=jax.ShapeDtypeStruct((1, c), implicit.dtype),
        # Gridless, single invocation: full-array VMEM blocks, no pipelining.
        in_specs=[pl.BlockSpec(memory_space=pltpu.MemorySpace.VMEM)],
        out_specs=pl.BlockSpec(memory_space=pltpu.MemorySpace.VMEM),
    )(imp2d)

    return out2d.reshape(1, c, 1, 1)


# ----------------------------------------------------------------------------
# Kernel 2: the real consumer, fused — y = x + implicit (broadcast over N,H,W).
# Lane-dense layout: (N*C, H*W) with H*W on the 128-lane axis.
# ----------------------------------------------------------------------------
def _implicit_add_kernel(x_ref, imp_ref, out_ref):
    # x_ref: (N*C, H*W), imp_ref: (N*C, 1) — per-row scalar broadcast along lanes.
    out_ref[...] = x_ref[...] + imp_ref[...]


@jax.jit
def implicit_a_apply(x, implicit):
    """Fused hot path: y = x + implicit, x: (N, C, H, W), implicit: (1, C, 1, 1)."""
    n, c, h, w = x.shape
    assert implicit.shape == (1, c, 1, 1)

    # Flatten to (N*C, H*W): H*W = 256 here, a multiple of 128 → unmasked vst,
    # full VPU lanes (vs ~12.5% lane utilization with W=16 on the lane axis).
    x2d = x.reshape(n * c, h * w)
    # One scalar per (n, c) row, broadcast along lanes inside the kernel.
    imp_rows = jnp.broadcast_to(implicit.reshape(1, c), (n, c)).reshape(n * c, 1)

    out2d = pl.pallas_call(
        _implicit_add_kernel,
        out_shape=jax.ShapeDtypeStruct((n * c, h * w), x.dtype),
        # Gridless full-array blocks: (8, 256) f32 ≈ 8 KiB, trivially fits VMEM
        # on all generations; no grid/pipelining needed at this size.
        in_specs=[pl.BlockSpec(memory_space=pltpu.MemorySpace.VMEM),
                  pl.BlockSpec(memory_space=pltpu.MemorySpace.VMEM)],
        out_specs=pl.BlockSpec(memory_space=pltpu.MemorySpace.VMEM),
    )(x2d, imp_rows)

    return out2d.reshape(n, c, h, w)


if __name__ == "__main__":
    channel = 4  # small, consistent with activations like x of shape (2, 4, 16, 16)

    key = jax.random.PRNGKey(0)
    k_imp, k_x = jax.random.split(key)

    # Deterministic parameter init matching nn.init.normal_(std=0.02)
    implicit = 0.02 * jax.random.normal(k_imp, (1, channel, 1, 1), dtype=jnp.float32)

    # Module-faithful forward(): identity on the parameter.
    out = implicit_a_forward(implicit)
    out = jax.block_until_ready(out)
    assert out.shape == (1, channel, 1, 1)
    assert jnp.allclose(out, implicit)

    # Fused real hot path: x + implicit.
    x = jax.random.normal(k_x, (2, channel, 16, 16), dtype=jnp.float32)
    y = implicit_a_apply(x, implicit)
    y = jax.block_until_ready(y)
    assert y.shape == x.shape
    assert jnp.allclose(y, x + implicit)

    print("KERNEL_OK")
</pallas_src>

<mosaic_0001>
module attributes {stable_mosaic.version = 11 : i64} {
  func.func @_implicit_a_kernel(%arg0: memref<1x4xf32, #tpu.memory_space<vmem>>, %arg1: memref<1x4xf32, #tpu.memory_space<vmem>>) attributes {dimension_semantics = [], scalar_prefetch = 0 : i64, scratch_operands = 0 : i64, tpu.core_type = #tpu.core_type<tc>} {
    %c0 = arith.constant 0 : index
    %c0_0 = arith.constant 0 : index
    %0 = vector.load %arg0[%c0, %c0_0] : memref<1x4xf32, #tpu.memory_space<vmem>>, vector<1x4xf32>
    %c0_1 = arith.constant 0 : index
    %c0_2 = arith.constant 0 : index
    %1 = vector.load %arg1[%c0_1, %c0_2] : memref<1x4xf32, #tpu.memory_space<vmem>>, vector<1x4xf32>
    tpu.vector_store %arg1[%c0_1, %c0_2], %0 {strides = array<i32>} : memref<1x4xf32, #tpu.memory_space<vmem>>, vector<1x4xf32>,
    return
  }
}

</mosaic_0001>

<bundles_post_ra>
// kernel: implicit_a_forward.1
= control target key start
LH: loop header
LB: loop body
LE: loop exit
PB: predicated region body
PF: predicated region fallthrough
CT: control target
= control target key end

     0   :  { %vm10_vm0 = vcmask 24576   ;;  %s77_s0 = inlined_call_operand.vmem [shape: f32[1,4], index: 0, kind: input, shape index: {}]   ;;  %s78_s1 = inlined_call_operand.hbm [shape: f32[1,4], index: 1, kind: output, shape index: {}]  }
   0x1   :  { %v9_v0 = vld [vmem:[%s77_s0] sm:$0x1] }
   0x2   :  { %6 = vsyncpa [#allocation3], 0  ;;  %11 = vst.msk [vmem:[#allocation2] sm:$0x1] %vm10_vm0, %v9_v0  ;;  %s51_s8 = smov [#allocation2]  }
   0x3   :  { %s18_s9 = sshll.u32 %s51_s8, 4  ;;  %s19_s9 = int_to_ptr.vmem [resolvable:$true] %s18_s9 }
   0x4   :  { %s27_s10 = scalar_lea.vmem %s19_s9, 16  ;;  %s31_s11 = scalar_lea.vmem %s19_s9, 32 }
   0x5   :  { %p28_p0 = scmp.ne.s32.totalorder %s19_s9, %s27_s10  ;;  %p32_p1 = scmp.lt.s32.totalorder %s19_s9, %s19_s9 }
   0x6   :  { %p33_p2 = scmp.lt.s32.totalorder %s31_s11, %s27_s10 }
   0x8   :  { %p34_p3 = por %p33_p2, %p32_p1 }
   0xa   :  { %p35_p4 = pnand %p34_p3, %p28_p0 }
   0xc   :  { %38 = shalt.err (!%p35_p4)
}
   0xd   :  { %s39_s14 = scalar_lea.hbm %s78_s1, 16 }
   0xe   :  { %p40_p5 = scmp.ne.s32.totalorder %s78_s1, %s39_s14  ;;  %p43_p6 = scmp.lt.u32.totalorder %s39_s14, %s78_s1 }
  0x10   :  { %p45_p7 = pnand %p43_p6, %p40_p5 }
  0x12   :  { %48 = shalt.err (!%p45_p7)
}
  0x13   :  { %21 = dma.vmem_to_hbm [thread:$0]  %s19_s9, 16, %s78_s1, [#allocation3]  }
  0x14   :  { %49 = dma.done.wait [#allocation3], 16  }
  0x15   :  { %50 = vsyncadd [#allocation3], 4294967280 }
  0x16   :  { %25 = vsyncpa [#allocation3], 1 }

</bundles_post_ra>
